<compile_context>
chip_gen: v7x
topology: tpu7x:2x2x1
jax: 0.10.0
libtpu: 0.0.40
codegen_flags: <defaults>
</compile_context>

<pallas_src>
import random
from functools import partial
from collections import namedtuple

import numpy as np
import jax
import jax.numpy as jnp
from jax.experimental import pallas as pl
from jax.experimental.pallas import tpu as pltpu

UnpoolDescription = namedtuple(
    "UnpoolDescription",
    ["edge_index", "cluster", "batch", "new_edge_score", "old_edge_score"],
)


# ----------------------------------------------------------------------------
# Pallas kernel: zT = (x @ W_comb)^T, computed directly in transposed
# orientation so the store is lane-dense (node rows on the lane axis).
#   W_comb^T rows [0:Cout] -> transform weight Wt
#   W_comb^T row  [Cout]   -> transform followed by score_net (Ws @ Wt)
# ----------------------------------------------------------------------------
def _node_transform_kernel(x_ref, wt_ref, zt_ref):
    # lhs: W_comb^T (Cout+1, Cin); rhs: x (tm, Cin); contract both on Cin.
    # NT dot_general -> output (Cout+1, tm), f32 MXU accumulation.
    acc = jax.lax.dot_general(
        wt_ref[...], x_ref[...],
        dimension_numbers=(((1,), (1,)), ((), ())),
        preferred_element_type=jnp.float32,
    )
    zt_ref[...] = acc.astype(zt_ref.dtype)


def _ceil_to(a, b):
    return ((a + b - 1) // b) * b


def node_transform(x, w_comb_t, *, tm=1024, storage_dtype=jnp.bfloat16):
    """x: (M, Cin); w_comb_t: (Cout+1, Cin).

    Returns zT: (Cout+1, M) in storage_dtype, where zT = (x @ W_comb)^T
    (no bias; biases are applied in the wrapper).
    """
    M, cin = x.shape
    cw = w_comb_t.shape[0]

    if M >= 256:
        # 128-aligned tile, clamped so the grid has >= 2 steps (v7x megacore).
        tm_eff = min(tm, _ceil_to(pl.cdiv(M, 2), 128))
        grid_m = pl.cdiv(M, tm_eff)          # ragged trailing block is fine:
        # OOB x rows are undefined but only feed OOB zT columns (dropped).
    else:
        tm_eff = M                           # single full-array block, no pad
        grid_m = 1

    x_s = x.astype(storage_dtype)
    w_s = w_comb_t.astype(storage_dtype)

    itemsize = jnp.dtype(storage_dtype).itemsize
    # Double-buffered x block + zT block + weights, plus headroom; clamp to a
    # budget that also fits v7x's 64 MiB-per-TC VMEM.
    vmem_need = 2 * itemsize * (tm_eff * cin + cw * tm_eff + cw * cin)
    vmem_limit = int(min(48 * 1024 * 1024, max(16 * 1024 * 1024, 4 * vmem_need)))

    cost = pl.CostEstimate(
        flops=2 * M * cin * cw,
        transcendentals=0,
        bytes_accessed=itemsize * (M * cin + cw * cin + cw * M),
    )

    # W_comb^T is tiny (a few KiB); double-buffering it is negligible, so no
    # pl.Buffered(1) override is needed at these channel counts.
    zt = pl.pallas_call(
        _node_transform_kernel,
        out_shape=jax.ShapeDtypeStruct((cw, M), storage_dtype),
        grid=(grid_m,),
        in_specs=[
            pl.BlockSpec((tm_eff, cin), lambda i: (i, 0)),
            pl.BlockSpec((cw, cin), lambda i: (0, 0)),
        ],
        out_specs=pl.BlockSpec((cw, tm_eff), lambda i: (0, i)),
        compiler_params=pltpu.CompilerParams(
            dimension_semantics=("parallel",),
            vmem_limit_bytes=vmem_limit),
        cost_estimate=cost,
    )(x_s, w_s)
    return zt


# ----------------------------------------------------------------------------
# Jitted device-side portion of forward: kernel + edge gather + sigmoid.
# ----------------------------------------------------------------------------
@partial(jax.jit, static_argnames=("out_channels", "tm", "storage_dtype"))
def _edge_pool_device(x, src, dst, w_comb_t, bt, score_bias, *,
                      out_channels, tm, storage_dtype):
    zt = node_transform(x, w_comb_t, tm=tm,
                        storage_dtype=storage_dtype).astype(jnp.float32)
    z_y = zt[:out_channels]                  # (Cout, N) = (x @ Wt^T)^T, no bias
    z_s = zt[out_channels]                   # (N,)      = x @ Wt^T @ Ws^T, no bias
    # transform(x[src] + x[dst]) == z_y[:,src] + z_y[:,dst] + bt  (linearity)
    x_merged = (z_y[:, src] + z_y[:, dst]).T + bt          # (E, Cout)
    # transform(2x) == 2*z_y + bt  (self-merge path, derived in-wrapper)
    x_merged_self = (2.0 * z_y).T + bt                      # (N, Cout)
    # sigmoid(score_net(transform(x[src]+x[dst]))), dropout p=0, add=0.0
    # TODO(synk): score gather/sigmoid could be fused in-kernel via scalar
    # prefetch of edge_index, but host merge_edges dominates end-to-end.
    e = jax.nn.sigmoid(z_s[src] + z_s[dst] + score_bias)    # (E,)
    return x_merged, x_merged_self, e


# ----------------------------------------------------------------------------
# Host-side greedy edge contraction (__merge_edges__): sequential,
# data-dependent loop with Python `random`.
# TODO(synk): __merge_edges__ is inherently sequential/stochastic; kept on host
# (device->host sync per forward dominates latency, not the kernel).
# ----------------------------------------------------------------------------
def merge_edges_host(x, edge_index, batch, edge_score, x_merged, x_merged_self):
    n = x.shape[0]
    nodes_remaining = set(range(n))
    cluster = np.empty(n, dtype=np.int64)
    order = np.argsort(-edge_score)          # descending edge scores
    i = 0
    new_edge_indices = []
    emb_cat = []
    for eidx in order.tolist():
        source = int(edge_index[0, eidx])
        r = random.random()
        if r > edge_score[eidx]:
            continue
        if source not in nodes_remaining:
            continue
        target = int(edge_index[1, eidx])
        if target not in nodes_remaining:
            continue
        emb_cat.append(x_merged[eidx])
        new_edge_indices.append(eidx)
        cluster[source] = i
        nodes_remaining.remove(source)
        if source != target:
            cluster[target] = i
            nodes_remaining.remove(target)
        i += 1
    for node_idx in sorted(nodes_remaining):
        cluster[node_idx] = i
        emb_cat.append(x_merged_self[node_idx])
        i += 1
    new_x = np.vstack(emb_cat)
    new_edge_score = edge_score[np.asarray(new_edge_indices, dtype=np.int64)]
    if len(nodes_remaining) > 0:
        remaining_score = np.ones(new_x.shape[0] - len(new_edge_indices),
                                  dtype=x.dtype)
        new_edge_score = np.concatenate([new_edge_score, remaining_score])
    # coalesce(cluster[edge_index]) + remove_self_loops
    ne = cluster[edge_index]
    if ne.shape[1] > 0:
        ne = np.unique(ne, axis=1)           # sort + dedup (coalesce)
        ne = ne[:, ne[0] != ne[1]]           # remove self loops
    new_batch = np.empty(new_x.shape[0], dtype=np.int64)
    new_batch[cluster] = batch
    unpool_info = UnpoolDescription(edge_index=edge_index, cluster=cluster,
                                    batch=batch, new_edge_score=new_edge_score,
                                    old_edge_score=edge_score)
    return new_x, ne, new_batch, unpool_info


# ----------------------------------------------------------------------------
# EdgePooling forward (merge_method='sum', edge_score_method='sigmoid',
# dropout=0, add_to_edge_score=0.0)
# ----------------------------------------------------------------------------
class EdgePoolingPallas:
    def __init__(self, in_channels, out_channels, key, use_bf16=True, tm=1024):
        self.in_channels = in_channels
        self.out_channels = out_channels
        self.tm = tm
        self.storage_dtype = jnp.bfloat16 if use_bf16 else jnp.float32
        k1, k2, k3, k4 = jax.random.split(key, 4)
        # torch.nn.Linear default init: U(-1/sqrt(fan_in), 1/sqrt(fan_in))
        kt = 1.0 / np.sqrt(in_channels)
        ks = 1.0 / np.sqrt(out_channels)
        wt = jax.random.uniform(k1, (out_channels, in_channels), jnp.float32, -kt, kt)
        bt = jax.random.uniform(k2, (out_channels,), jnp.float32, -kt, kt)
        ws = jax.random.uniform(k3, (1, out_channels), jnp.float32, -ks, ks)
        bs = jax.random.uniform(k4, (1,), jnp.float32, -ks, ks)
        # Fold score Linear into transform Linear (exact linear composition).
        # W_comb^T = [ Wt ; Ws @ Wt ]  -> (Cout+1, Cin)
        self.w_comb_t = jnp.concatenate([wt, ws @ wt], axis=0)
        self.bt = bt.reshape(1, out_channels)                 # (1, Cout)
        self.score_bias = (bt @ ws.T + bs)[0]                 # scalar

    def forward(self, x, edge_index, batch):
        src, dst = edge_index[0], edge_index[1]
        x_merged, x_merged_self, e = _edge_pool_device(
            x, src, dst, self.w_comb_t, self.bt, self.score_bias,
            out_channels=self.out_channels, tm=self.tm,
            storage_dtype=self.storage_dtype)
        jax.block_until_ready((x_merged, x_merged_self, e))
        merged = merge_edges_host(np.asarray(x), np.asarray(edge_index),
                                  np.asarray(batch), np.asarray(e),
                                  np.asarray(x_merged), np.asarray(x_merged_self))
        return merged, (x_merged, x_merged_self, e)


if __name__ == "__main__":
    random.seed(0)                         # deterministic greedy contraction
    key = jax.random.PRNGKey(0)
    k_x, k_p, k_s, k_d, k_big = jax.random.split(key, 5)

    N, Cin, Cout = 16, 8, 16               # 2 graphs of 8 nodes each
    E_per = 12
    x = jax.random.normal(k_x, (N, Cin), jnp.float32)
    src0 = jax.random.randint(k_s, (E_per,), 0, 8)
    dst0 = jax.random.randint(k_d, (E_per,), 0, 8)
    edge_index = jnp.concatenate(
        [jnp.stack([src0, dst0]), jnp.stack([src0 + 8, dst0 + 8])], axis=1
    ).astype(jnp.int32)                     # (2, 24), edges stay within graphs
    batch = jnp.concatenate(
        [jnp.zeros(8, jnp.int32), jnp.ones(8, jnp.int32)])

    pool = EdgePoolingPallas(Cin, Cout, k_p)
    (new_x, new_edge_index, new_batch, unpool_info), (xm, xms, e) = \
        pool.forward(x, edge_index, batch)

    jax.block_until_ready((xm, xms, e))
    assert xm.shape == (edge_index.shape[1], Cout)
    assert xms.shape == (N, Cout)
    assert e.shape == (edge_index.shape[1],)
    assert new_x.shape[1] == Cout

    # Exercise the multi-step grid with a ragged trailing block and check the
    # kernel against a plain-JAX reference (bf16-storage tolerance).
    M_big = 300
    x_big = jax.random.normal(k_big, (M_big, Cin), jnp.float32)
    zt_big = node_transform(x_big, pool.w_comb_t, tm=pool.tm,
                            storage_dtype=pool.storage_dtype).astype(jnp.float32)
    jax.block_until_ready(zt_big)
    assert zt_big.shape == (Cout + 1, M_big)
    x_r = x_big.astype(pool.storage_dtype).astype(jnp.float32)
    w_r = pool.w_comb_t.astype(pool.storage_dtype).astype(jnp.float32)
    ref = (x_r @ w_r.T).T
    err = float(jnp.max(jnp.abs(zt_big - ref)))
    assert err < 5e-2, err

    print("KERNEL_OK")
</pallas_src>

<mosaic_0001>
module attributes {stable_mosaic.version = 11 : i64} {
  func.func @_node_transform_kernel(%arg0: i32, %arg1: memref<16x8xbf16, #tpu.memory_space<vmem>>, %arg2: memref<17x8xbf16, #tpu.memory_space<vmem>>, %arg3: memref<17x16xbf16, #tpu.memory_space<vmem>>) attributes {dimension_semantics = [#tpu.dimension_semantics<parallel>], iteration_bounds = array<i64: 1>, scalar_prefetch = 0 : i64, scratch_operands = 0 : i64, tpu.core_type = #tpu.core_type<tc>, window_params = [{transform_indices = @transform_0, window_bounds = array<i64: 16, 8>}, {pipeline_mode = #tpu.pipeline_mode<synchronous>, transform_indices = @transform_1, window_bounds = array<i64: 17, 8>}, {transform_indices = @transform_2, window_bounds = array<i64: 17, 16>}]} {
    %c0 = arith.constant 0 : index
    %c0_0 = arith.constant 0 : index
    %0 = vector.load %arg2[%c0, %c0_0] : memref<17x8xbf16, #tpu.memory_space<vmem>>, vector<17x8xbf16>
    %c0_1 = arith.constant 0 : index
    %c0_2 = arith.constant 0 : index
    %1 = vector.load %arg1[%c0_1, %c0_2] : memref<16x8xbf16, #tpu.memory_space<vmem>>, vector<16x8xbf16>
    %cst = arith.constant dense<0.000000e+00> : vector<17x16xf32>
    %2 = tpu.matmul %0, %1, %cst {dimension_numbers = #tpu.dot_dimension_numbers<[1], [1], [0], [0], [0, 0, 1, 0], [], []>} : vector<17x8xbf16>, vector<16x8xbf16>, vector<17x16xf32> -> vector<17x16xf32>
    %3 = arith.truncf %2 : vector<17x16xf32> to vector<17x16xbf16>
    %c0_3 = arith.constant 0 : index
    %c0_4 = arith.constant 0 : index
    %4 = vector.load %arg3[%c0_3, %c0_4] : memref<17x16xbf16, #tpu.memory_space<vmem>>, vector<17x16xbf16>
    tpu.vector_store %arg3[%c0_3, %c0_4], %3 {strides = array<i32>} : memref<17x16xbf16, #tpu.memory_space<vmem>>, vector<17x16xbf16>,
    return
  }
  func.func @transform_0(%arg0: i32) -> (i32, i32) {
    %c0_i32 = arith.constant 0 : i32
    %c0_i32_0 = arith.constant 0 : i32
    return %arg0, %c0_i32 : i32, i32
  }
  func.func @transform_1(%arg0: i32) -> (i32, i32) {
    %c0_i32 = arith.constant 0 : i32
    %c0_i32_0 = arith.constant 0 : i32
    %c0_i32_1 = arith.constant 0 : i32
    return %c0_i32, %c0_i32_0 : i32, i32
  }
  func.func @transform_2(%arg0: i32) -> (i32, i32) {
    %c0_i32 = arith.constant 0 : i32
    %c0_i32_0 = arith.constant 0 : i32
    return %c0_i32, %arg0 : i32, i32
  }
}

</mosaic_0001>

<bundles_post_ra>
// kernel: _edge_pool_device.1
= control target key start
LH: loop header
LB: loop body
LE: loop exit
PB: predicated region body
PF: predicated region fallthrough
CT: control target
= control target key end

     0   :  { %vm30_vm0 = vcmask 64512   ;;  %vm104_vm1 = vcmask 122880   ;;  %vm105_vm2 = vsmask.f32 256  ;;  %vm101_vm4 = vcmask 125952   ;;  %s174_s0 = inlined_call_operand.vmem [shape: bf16[16,8], index: 0, kind: input, shape index: {}]   ;;  %s175_s1 = inlined_call_operand.vmem [shape: bf16[17,8], index: 1, kind: input, shape index: {}]   ;;  %s176_s2 = inlined_call_operand.vmem [shape: bf16[17,16], index: 2, kind: output, shape index: {}]  }
   0x1   :  { %v135_v0 = vld [vmem:[%s174_s0] sm:$0xff]   ;;  %v137_v3 = vld [vmem:[%s175_s1 + $0x8] ss:$0 sps:$4 sm:$0x11]   ;;  %vm106_vm3 = vmand %vm104_vm1, %vm105_vm2 }
   0x2   :  { %134 = vmatprep.subr.msk.bf16.mxu0 %vm30_vm0, %v135_v0  ;;  %v38_v1 = vsel %vm30_vm0, %v135_v0, 0  ;;  %v136_v2 = vld [vmem:[%s175_s1] sm:$0xff]   ;;  %v107_v5 = vld [vmem:[%s176_s2 + $0x8] sm:$0x1] }
   0x3   :  { %129 = vmatpush3.bf16.xpose.msra.mxu0 %v38_v1  ;;  %130 = vmatprep.mubr.msk.bf16.mxu0 %vm30_vm0, %v136_v2 }
   0xa   :  { %131 = vmatmul.mubr.msk.bf16.vlgmr.msra.gmra.mrb[0].mxu0 %vm30_vm0, %v137_v3 }
  0xdd   :  { %v132_v4 = vpop.f32.mrb[0].mxu0 }
  0xde   :  { %v124_v6 = vpack.c.bf16 %v132_v4, %v132_v4  ;;  %v74_v7 = vpop.f32.mrb[1].mxu0 }
  0xdf   :  { %v122_v8 = vpack.c.bf16 %v74_v7, %v74_v7  ;;  %v133_v9 = vpop.f32.mrb[2].mxu0 }
  0xe0   :  { %v108_v10 = vsel %vm106_vm3, %v124_v6, %v107_v5  ;;  %v77_v11 = vpop.f32.mrb[3].mxu0 }
  0xe1   :  { %109 = vst [vmem:[%s176_s2 + $0x8] sm:$0x1] %v108_v10  ;;  %102 = vst.msk [vmem:[%s176_s2] sm:$0xf] %vm101_vm4, %v122_v8  ;;  %v123_v12 = vpack.c.bf16 %v77_v11, %v77_v11 }
  0xe3   :  { %103 = vst.msk [vmem:[%s176_s2 + $0x4] sm:$0xf] %vm101_vm4, %v123_v12 }

</bundles_post_ra>
